<compile_context>
chip_gen: v5e
topology: v5e:2x2
jax: 0.10.0
libtpu: 0.0.40
codegen_flags: <defaults>
</compile_context>

<pallas_src>
import functools

import jax
import jax.numpy as jnp
import numpy as np
from jax.experimental import pallas as pl
from jax.experimental.pallas import tpu as pltpu


def mha_stats_kernel(xq_ref, xkv_ref, mask_ref, wqkv_ref, wo_ref,
                     h_ref, sum_ref, sq_ref, kv_ref, *, n_heads, key_dim):
    """One (batch, query-tile) grid step: fused MHA + skip + ReLU + partial BN stats."""
    H, Kd = n_heads, key_dim
    hk = H * Kd
    tq = xq_ref.shape[1]          # query-tile rows
    N = xkv_ref.shape[1]          # full sequence length (key/value side)
    qi = pl.program_id(1)

    # ---- once per batch: K|V projection for the whole sequence, cached in VMEM ----
    @pl.when(qi == 0)
    def _():
        x_all = xkv_ref[0].astype(jnp.bfloat16)                       # (N, D)
        kv = jnp.dot(x_all, wqkv_ref[:, hk:],                         # bf16 x bf16 -> f32 acc
                     preferred_element_type=jnp.float32)              # (N, 2*H*Kd)
        kv_ref[...] = kv.astype(jnp.bfloat16)
        sum_ref[...] = jnp.zeros_like(sum_ref)                        # resident BN accumulators
        sq_ref[...] = jnp.zeros_like(sq_ref)

    # ---- query tile: fused Q projection (1/sqrt(Kd) folded into the weights) ------
    x_q = xq_ref[0]                                                    # (tq, D) f32
    q = jnp.dot(x_q.astype(jnp.bfloat16), wqkv_ref[:, :hk],
                preferred_element_type=jnp.float32).astype(jnp.bfloat16)   # (tq, H*Kd)

    mask_b = mask_ref[0] != 0                                          # (tq, N) bool, True = disallowed
    neg_big = jnp.float32(-1e30)                                       # finite, avoids -inf -> NaN

    # ---- attention: per-head 2-D lane-slice views; softmax math stays f32 ---------
    head_outs = []
    for h in range(H):
        qh = q[:, h * Kd:(h + 1) * Kd]                                 # (tq, Kd) bf16 lane slice
        kh = kv_ref[:, h * Kd:(h + 1) * Kd]                            # (N, Kd)  bf16 lane slice
        s = jax.lax.dot_general(qh, kh, (((1,), (1,)), ((), ())),
                                preferred_element_type=jnp.float32)    # (tq, N)  f32
        s = jnp.where(mask_b, neg_big, s)
        m = jnp.max(s, axis=-1, keepdims=True)
        e = jnp.exp(s - m)
        denom = jnp.sum(e, axis=-1, keepdims=True)
        attn = e * pl.reciprocal(denom, approx=True)                   # divide on the EUP slot
        attn = jnp.where(mask_b, 0.0, attn)    # load-bearing: fully-masked rows output 0
        vh = kv_ref[:, hk + h * Kd: hk + (h + 1) * Kd]                 # (N, Kd) bf16
        head_outs.append(jnp.dot(attn.astype(jnp.bfloat16), vh,
                                 preferred_element_type=jnp.float32))  # (tq, Kd) f32

    # ---- fused output projection + head-sum: one (tq, H*Kd) @ (H*Kd, D) matmul ----
    heads = jnp.concatenate(head_outs, axis=-1).astype(jnp.bfloat16)   # (tq, H*Kd)
    mha = jnp.dot(heads, wo_ref[...], preferred_element_type=jnp.float32)   # (tq, D)

    # ---- skip connection + ReLU ---------------------------------------------------
    h_act = jnp.maximum(x_q + mha, 0.0)                                # (tq, D) f32
    h_ref[0] = h_act.astype(h_ref.dtype)                               # bf16 intermediate

    # ---- partial BatchNorm statistics (f32 accumulators, written back once per b) --
    h_stat = h_act
    if N % tq != 0:   # cdiv boundary tile: exclude padded rows from the statistics
        row = jax.lax.broadcasted_iota(jnp.int32, (tq, 1), 0)
        h_stat = jnp.where(row < N - qi * tq, h_act, 0.0)
    sum_ref[0] += jnp.sum(h_stat, axis=0, keepdims=True)               # (1, D)
    sq_ref[0] += jnp.sum(h_stat * h_stat, axis=0, keepdims=True)       # (1, D)


def bn_apply_kernel(h_ref, scale_ref, shift_ref, o_ref):
    """Affine BatchNorm application over a lane-dense (rows, D) slab (HBM-BW bound)."""
    h = h_ref[...].astype(jnp.float32)
    o_ref[...] = (h * scale_ref[...] + shift_ref[...]).astype(o_ref.dtype)


def _vmem_limit_bytes():
    """Explicit scoped-VMEM budget (v7x has 64 MiB physical VMEM, half of v5e/v6e)."""
    try:
        cap = pltpu.get_tpu_info().vmem_capacity_bytes
        return int(min(cap - (16 << 20), (cap * 3) // 4))
    except Exception:
        return 64 << 20


def graph_attention_layer(x, mask, params, *, n_heads, key_dim, eps=1e-5):
    B, N, D = x.shape
    hk = n_heads * key_dim

    # compact int8 mask (4x less HBM/VMEM than f32); bf16 weights for the bf16 MXU
    mask_i8 = (mask > 0.5).astype(jnp.int8)
    wqkv = params['wqkv'].astype(jnp.bfloat16)                      # (D, 3*H*Kd)
    wo2d = params['wo'].reshape(hk, D).astype(jnp.bfloat16)         # (H*Kd, D) head-major

    # query tiling: scores/attn become (tq, N) per head instead of (N, N)
    tq = N if N <= 256 else 256
    n_qt = pl.cdiv(N, tq)
    vmem_limit = _vmem_limit_bytes()

    kernel1 = functools.partial(mha_stats_kernel, n_heads=n_heads, key_dim=key_dim)
    h_act, part_sum, part_sq = pl.pallas_call(
        kernel1,
        out_shape=(jax.ShapeDtypeStruct((B, N, D), jnp.bfloat16),   # bf16 intermediate
                   jax.ShapeDtypeStruct((B, 1, D), jnp.float32),
                   jax.ShapeDtypeStruct((B, 1, D), jnp.float32)),
        grid=(B, n_qt),
        in_specs=[pl.BlockSpec((1, tq, D), lambda b, q: (b, q, 0)),   # query rows
                  pl.BlockSpec((1, N, D), lambda b, q: (b, 0, 0)),    # full seq for K/V (DMA'd once per b)
                  pl.BlockSpec((1, tq, N), lambda b, q: (b, q, 0)),   # int8 mask rows
                  pl.BlockSpec((D, 3 * hk), lambda b, q: (0, 0)),     # constant weights
                  pl.BlockSpec((hk, D), lambda b, q: (0, 0))],
        out_specs=(pl.BlockSpec((1, tq, D), lambda b, q: (b, q, 0)),
                   pl.BlockSpec((1, 1, D), lambda b, q: (b, 0, 0)),   # resident accumulators
                   pl.BlockSpec((1, 1, D), lambda b, q: (b, 0, 0))),
        scratch_shapes=[pltpu.VMEM((N, 2 * hk), jnp.bfloat16)],       # cached K|V projection
        compiler_params=pltpu.CompilerParams(
            dimension_semantics=("parallel", "arbitrary"),            # b parallel, q-tiles sequential
            vmem_limit_bytes=vmem_limit),
    )(x, x, mask_i8, wqkv, wo2d)

    # tiny O(B*D) finalize of the two-phase BatchNorm reduction (kept in f32)
    tokens = jnp.float32(B * N)
    mean = jnp.sum(part_sum, axis=(0, 1)) / tokens                    # (D,)
    var = jnp.maximum(jnp.sum(part_sq, axis=(0, 1)) / tokens - mean * mean, 0.0)
    rstd = jax.lax.rsqrt(var + eps)
    scale = (params['gamma'] * rstd)[None, :]                         # (1, D)
    shift = (params['beta'] - mean * params['gamma'] * rstd)[None, :]

    # apply normalization over the flattened (B*N, D) token slab.
    # Note: unmasked lane-dense stores need D % 128 == 0 (true at production widths);
    # the demo's D=32 equals the full array dim so the BlockSpec remains legal.
    rows = B * N
    tile_rows = rows if rows <= 1024 else 1024                        # cdiv-robust tiling
    out2d = pl.pallas_call(
        bn_apply_kernel,
        out_shape=jax.ShapeDtypeStruct((rows, D), x.dtype),
        grid=(pl.cdiv(rows, tile_rows),),
        in_specs=[pl.BlockSpec((tile_rows, D), lambda i: (i, 0)),
                  pl.BlockSpec((1, D), lambda i: (0, 0)),
                  pl.BlockSpec((1, D), lambda i: (0, 0))],
        out_specs=pl.BlockSpec((tile_rows, D), lambda i: (i, 0)),
        compiler_params=pltpu.CompilerParams(
            dimension_semantics=("parallel",),
            vmem_limit_bytes=vmem_limit),
    )(h_act.reshape(rows, D), scale, shift)
    return out2d.reshape(B, N, D)


def reference_forward(x, mask, params, *, n_heads, key_dim, eps=1e-5):
    """Pure-JAX f32 reference mirroring the PyTorch forward (for validation)."""
    masked = mask > 0.5
    nf = 1.0 / np.sqrt(key_dim)
    outs = []
    for h in range(n_heads):
        q = jnp.einsum('bnd,dk->bnk', x, params['wq'][h])
        k = jnp.einsum('bnd,dk->bnk', x, params['wk'][h])
        v = jnp.einsum('bnd,dk->bnk', x, params['wv'][h])
        compat = nf * jnp.einsum('bqk,bnk->bqn', q, k)
        compat = jnp.where(masked, -jnp.inf, compat)
        attn = jax.nn.softmax(compat, axis=-1)
        attn = jnp.where(masked, 0.0, attn)
        outs.append(jnp.einsum('bqn,bnk->bqk', attn, v))
    heads = jnp.stack(outs, axis=0)                                   # (H, B, N, Kd)
    mha = jnp.einsum('hbnk,hkd->bnd', heads, params['wo'])
    h_act = jnp.maximum(x + mha, 0.0)
    mean = jnp.mean(h_act, axis=(0, 1), keepdims=True)
    var = jnp.mean((h_act - mean) ** 2, axis=(0, 1), keepdims=True)
    return (h_act - mean) * jax.lax.rsqrt(var + eps) * params['gamma'] + params['beta']


def init_params(key, n_heads, embed_dim):
    key_dim = embed_dim // n_heads
    k1, k2, k3, k4 = jax.random.split(key, 4)
    stdv = 1.0 / np.sqrt(embed_dim)          # Kool-style uniform init
    stdv_o = 1.0 / np.sqrt(key_dim)

    def uniform(k, shape, s):
        return jax.random.uniform(k, shape, jnp.float32, -s, s)

    wq = uniform(k1, (n_heads, embed_dim, key_dim), stdv)    # (H, D, Kd)
    wk = uniform(k2, (n_heads, embed_dim, key_dim), stdv)
    wv = uniform(k3, (n_heads, embed_dim, key_dim), stdv)
    wo = uniform(k4, (n_heads, key_dim, embed_dim), stdv_o)  # (H, Kd, D)

    # Kernel packing: fuse Q|K|V head-major into one (D, 3*H*Kd) weight and fold the
    # 1/sqrt(Kd) attention scale into the Q block (free at run time).
    wqkv = jnp.stack([wq / np.sqrt(key_dim), wk, wv], axis=0)             # (3, H, D, Kd)
    wqkv = jnp.transpose(wqkv, (2, 0, 1, 3)).reshape(embed_dim, 3 * n_heads * key_dim)

    params = {
        'wqkv': wqkv,
        'wo': wo,
        'gamma': jnp.ones((embed_dim,), jnp.float32),   # BatchNorm1d affine defaults
        'beta': jnp.zeros((embed_dim,), jnp.float32),
        # unpacked f32 copies used only by the pure-JAX reference
        'wq': wq, 'wk': wk, 'wv': wv,
    }
    return params, key_dim


if __name__ == "__main__":
    n_heads, embed_dim = 4, 32
    B, N = 2, 8

    root = jax.random.PRNGKey(0)
    k_x, k_p = jax.random.split(root)

    params, key_dim = init_params(k_p, n_heads, embed_dim)
    x = jax.random.normal(k_x, (B, N, embed_dim), jnp.float32)

    # deterministic mask: no query may attend to the last 2 nodes
    col = jnp.arange(N)[None, None, :]
    mask = jnp.broadcast_to((col >= N - 2).astype(jnp.float32), (B, N, N))

    out = graph_attention_layer(x, mask, params, n_heads=n_heads, key_dim=key_dim)
    out = jax.block_until_ready(out)

    ref = reference_forward(x, mask, params, n_heads=n_heads, key_dim=key_dim)
    # Tolerance reflects bf16 MXU operands / bf16 h_act intermediate vs. the f32 reference.
    np.testing.assert_allclose(np.asarray(out), np.asarray(ref), rtol=5e-2, atol=5e-2)

    print("KERNEL_OK")
</pallas_src>

<mosaic_0001>
module attributes {stable_mosaic.version = 11 : i64} {
  func.func @mha_stats_kernel(%arg0: i32, %arg1: i32, %arg2: memref<1x8x32xf32, #tpu.memory_space<vmem>>, %arg3: memref<1x8x32xf32, #tpu.memory_space<vmem>>, %arg4: memref<1x8x8xi8, #tpu.memory_space<vmem>>, %arg5: memref<32x96xbf16, #tpu.memory_space<vmem>>, %arg6: memref<32x32xbf16, #tpu.memory_space<vmem>>, %arg7: memref<1x8x32xbf16, #tpu.memory_space<vmem>>, %arg8: memref<1x1x32xf32, #tpu.memory_space<vmem>>, %arg9: memref<1x1x32xf32, #tpu.memory_space<vmem>>, %arg10: memref<8x64xbf16, #tpu.memory_space<vmem>>) attributes {dimension_semantics = [#tpu.dimension_semantics<parallel>, #tpu.dimension_semantics<arbitrary>], iteration_bounds = array<i64: 2, 1>, scalar_prefetch = 0 : i64, scratch_operands = 1 : i64, tpu.core_type = #tpu.core_type<tc>, window_params = [{transform_indices = @transform_0, window_bounds = array<i64: 1, 8, 32>}, {transform_indices = @transform_1, window_bounds = array<i64: 1, 8, 32>}, {transform_indices = @transform_2, window_bounds = array<i64: 1, 8, 8>}, {pipeline_mode = #tpu.pipeline_mode<synchronous>, transform_indices = @transform_3, window_bounds = array<i64: 32, 96>}, {pipeline_mode = #tpu.pipeline_mode<synchronous>, transform_indices = @transform_4, window_bounds = array<i64: 32, 32>}, {transform_indices = @transform_5, window_bounds = array<i64: 1, 8, 32>}, {transform_indices = @transform_6, window_bounds = array<i64: 1, 1, 32>}, {transform_indices = @transform_7, window_bounds = array<i64: 1, 1, 32>}]} {
    %c0_i32 = arith.constant 0 : i32
    %0 = arith.cmpi eq, %arg1, %c0_i32 : i32
    %1 = arith.extui %0 : i1 to i32
    %c0_i32_0 = arith.constant 0 : i32
    %2 = arith.cmpi ne, %1, %c0_i32_0 : i32
    scf.if %2 {
      %c0_62 = arith.constant 0 : index
      %c0_63 = arith.constant 0 : index
      %c0_64 = arith.constant 0 : index
      %121 = vector.load %arg3[%c0_62, %c0_63, %c0_64] : memref<1x8x32xf32, #tpu.memory_space<vmem>>, vector<1x8x32xf32>
      %122 = vector.shape_cast %121 : vector<1x8x32xf32> to vector<8x32xf32>
      %123 = arith.truncf %122 : vector<8x32xf32> to vector<8x32xbf16>
      %c0_65 = arith.constant 0 : index
      %c32_66 = arith.constant 32 : index
      %124 = vector.load %arg5[%c0_65, %c32_66] : memref<32x96xbf16, #tpu.memory_space<vmem>>, vector<32x64xbf16>
      %cst_67 = arith.constant dense<0.000000e+00> : vector<8x64xf32>
      %125 = tpu.matmul %123, %124, %cst_67 {dimension_numbers = #tpu.dot_dimension_numbers<[1], [0], [0], [1], [0, 0, 1, 1], [], []>} : vector<8x32xbf16>, vector<32x64xbf16>, vector<8x64xf32> -> vector<8x64xf32>
      %126 = arith.truncf %125 : vector<8x64xf32> to vector<8x64xbf16>
      %c0_68 = arith.constant 0 : index
      %c0_69 = arith.constant 0 : index
      %127 = vector.load %arg10[%c0_68, %c0_69] : memref<8x64xbf16, #tpu.memory_space<vmem>>, vector<8x64xbf16>
      tpu.vector_store %arg10[%c0_68, %c0_69], %126 {strides = array<i32>} : memref<8x64xbf16, #tpu.memory_space<vmem>>, vector<8x64xbf16>,
      %cst_70 = arith.constant 0.000000e+00 : f32
      %128 = vector.broadcast %cst_70 : f32 to vector<1x1x32xf32>
      %c0_71 = arith.constant 0 : index
      %c0_72 = arith.constant 0 : index
      %c0_73 = arith.constant 0 : index
      %129 = vector.load %arg8[%c0_71, %c0_72, %c0_73] : memref<1x1x32xf32, #tpu.memory_space<vmem>>, vector<1x1x32xf32>
      tpu.vector_store %arg8[%c0_71, %c0_72, %c0_73], %128 {strides = array<i32>} : memref<1x1x32xf32, #tpu.memory_space<vmem>>, vector<1x1x32xf32>,
      %cst_74 = arith.constant 0.000000e+00 : f32
      %130 = vector.broadcast %cst_74 : f32 to vector<1x1x32xf32>
      %c0_75 = arith.constant 0 : index
      %c0_76 = arith.constant 0 : index
      %c0_77 = arith.constant 0 : index
      %131 = vector.load %arg9[%c0_75, %c0_76, %c0_77] : memref<1x1x32xf32, #tpu.memory_space<vmem>>, vector<1x1x32xf32>
      tpu.vector_store %arg9[%c0_75, %c0_76, %c0_77], %130 {strides = array<i32>} : memref<1x1x32xf32, #tpu.memory_space<vmem>>, vector<1x1x32xf32>,
    } else {
    }
    %c0 = arith.constant 0 : index
    %c0_1 = arith.constant 0 : index
    %c0_2 = arith.constant 0 : index
    %3 = vector.load %arg2[%c0, %c0_1, %c0_2] : memref<1x8x32xf32, #tpu.memory_space<vmem>>, vector<1x8x32xf32>
    %4 = vector.shape_cast %3 : vector<1x8x32xf32> to vector<8x32xf32>
    %5 = arith.truncf %4 : vector<8x32xf32> to vector<8x32xbf16>
    %c0_3 = arith.constant 0 : index
    %c0_4 = arith.constant 0 : index
    %6 = vector.load %arg5[%c0_3, %c0_4] : memref<32x96xbf16, #tpu.memory_space<vmem>>, vector<32x32xbf16>
    %cst = arith.constant dense<0.000000e+00> : vector<8x32xf32>
    %7 = tpu.matmul %5, %6, %cst {dimension_numbers = #tpu.dot_dimension_numbers<[1], [0], [0], [1], [0, 0, 1, 1], [], []>} : vector<8x32xbf16>, vector<32x32xbf16>, vector<8x32xf32> -> vector<8x32xf32>
    %8 = arith.truncf %7 : vector<8x32xf32> to vector<8x32xbf16>
    %c0_5 = arith.constant 0 : index
    %c0_6 = arith.constant 0 : index
    %c0_7 = arith.constant 0 : index
    %9 = vector.load %arg4[%c0_5, %c0_6, %c0_7] : memref<1x8x8xi8, #tpu.memory_space<vmem>>, vector<1x8x8xi8>
    %10 = vector.shape_cast %9 : vector<1x8x8xi8> to vector<8x8xi8>
    %c0_i8 = arith.constant 0 : i8
    %11 = vector.broadcast %c0_i8 : i8 to vector<8x8xi8>
    %12 = arith.cmpi ne, %10, %11 : vector<8x8xi8>
    %13 = vector.extract_strided_slice %8 {offsets = [0, 0], sizes = [8, 8], strides = [1, 1]} : vector<8x32xbf16> to vector<8x8xbf16>
    %c0_8 = arith.constant 0 : index
    %c0_9 = arith.constant 0 : index
    %14 = vector.load %arg10[%c0_8, %c0_9] : memref<8x64xbf16, #tpu.memory_space<vmem>>, vector<8x8xbf16>
    %cst_10 = arith.constant dense<0.000000e+00> : vector<8x8xf32>
    %15 = tpu.matmul %13, %14, %cst_10 {dimension_numbers = #tpu.dot_dimension_numbers<[1], [1], [0], [0], [0, 0, 1, 0], [], []>} : vector<8x8xbf16>, vector<8x8xbf16>, vector<8x8xf32> -> vector<8x8xf32>
    %cst_11 = arith.constant -1.000000e+30 : f32
    %16 = vector.broadcast %cst_11 : f32 to vector<8x8xf32>
    %17 = arith.select %12, %16, %15 : vector<8x8xi1>, vector<8x8xf32>
    %cst_12 = arith.constant dense<0xFF800000> : vector<8xf32>
    %18 = vector.multi_reduction <maximumf>, %17, %cst_12 [1] : vector<8x8xf32> to vector<8xf32>
    %19 = vector.shape_cast %18 : vector<8xf32> to vector<8x1xf32>
    %20 = vector.broadcast %19 : vector<8x1xf32> to vector<8x8xf32>
    %21 = arith.subf %17, %20 : vector<8x8xf32>
    %22 = math.exp %21 : vector<8x8xf32>
    %cst_13 = arith.constant dense<0.000000e+00> : vector<8xf32>
    %23 = vector.multi_reduction <add>, %22, %cst_13 [1] : vector<8x8xf32> to vector<8xf32>
    %24 = vector.shape_cast %23 : vector<8xf32> to vector<8x1xf32>
    %25 = tpu.reciprocal %24 {approx = true} : vector<8x1xf32> -> vector<8x1xf32>
    %26 = vector.broadcast %25 : vector<8x1xf32> to vector<8x8xf32>
    %27 = arith.mulf %22, %26 : vector<8x8xf32>
    %cst_14 = arith.constant 0.000000e+00 : f32
    %28 = vector.broadcast %cst_14 : f32 to vector<8x8xf32>
    %29 = arith.select %12, %28, %27 : vector<8x8xi1>, vector<8x8xf32>
    %c0_15 = arith.constant 0 : index
    %c32 = arith.constant 32 : index
    %30 = vector.load %arg10[%c0_15, %c32] : memref<8x64xbf16, #tpu.memory_space<vmem>>, vector<8x8xbf16>
    %31 = arith.truncf %29 : vector<8x8xf32> to vector<8x8xbf16>
    %cst_16 = arith.constant dense<0.000000e+00> : vector<8x8xf32>
    %32 = tpu.matmul %31, %30, %cst_16 {dimension_numbers = #tpu.dot_dimension_numbers<[1], [0], [0], [1], [0, 0, 1, 1], [], []>} : vector<8x8xbf16>, vector<8x8xbf16>, vector<8x8xf32> -> vector<8x8xf32>
    %33 = vector.extract_strided_slice %8 {offsets = [0, 8], sizes = [8, 8], strides = [1, 1]} : vector<8x32xbf16> to vector<8x8xbf16>
    %c0_17 = arith.constant 0 : index
    %c8 = arith.constant 8 : index
    %34 = vector.load %arg10[%c0_17, %c8] : memref<8x64xbf16, #tpu.memory_space<vmem>>, vector<8x8xbf16>
    %cst_18 = arith.constant dense<0.000000e+00> : vector<8x8xf32>
    %35 = tpu.matmul %33, %34, %cst_18 {dimension_numbers = #tpu.dot_dimension_numbers<[1], [1], [0], [0], [0, 0, 1, 0], [], []>} : vector<8x8xbf16>, vector<8x8xbf16>, vector<8x8xf32> -> vector<8x8xf32>
    %cst_19 = arith.constant -1.000000e+30 : f32
    %36 = vector.broadcast %cst_19 : f32 to vector<8x8xf32>
    %37 = arith.select %12, %36, %35 : vector<8x8xi1>, vector<8x8xf32>
    %cst_20 = arith.constant dense<0xFF800000> : vector<8xf32>
    %38 = vector.multi_reduction <maximumf>, %37, %cst_20 [1] : vector<8x8xf32> to vector<8xf32>
    %39 = vector.shape_cast %38 : vector<8xf32> to vector<8x1xf32>
    %40 = vector.broadcast %39 : vector<8x1xf32> to vector<8x8xf32>
    %41 = arith.subf %37, %40 : vector<8x8xf32>
    %42 = math.exp %41 : vector<8x8xf32>
    %cst_21 = arith.constant dense<0.000000e+00> : vector<8xf32>
    %43 = vector.multi_reduction <add>, %42, %cst_21 [1] : vector<8x8xf32> to vector<8xf32>
    %44 = vector.shape_cast %43 : vector<8xf32> to vector<8x1xf32>
    %45 = tpu.reciprocal %44 {approx = true} : vector<8x1xf32> -> vector<8x1xf32>
    %46 = vector.broadcast %45 : vector<8x1xf32> to vector<8x8xf32>
    %47 = arith.mulf %42, %46 : vector<8x8xf32>
    %cst_22 = arith.constant 0.000000e+00 : f32
    %48 = vector.broadcast %cst_22 : f32 to vector<8x8xf32>
    %49 = arith.select %12, %48, %47 : vector<8x8xi1>, vector<8x8xf32>
    %c0_23 = arith.constant 0 : index
    %c40 = arith.constant 40 : index
    %50 = vector.load %arg10[%c0_23, %c40] : memref<8x64xbf16, #tpu.memory_space<vmem>>, vector<8x8xbf16>
    %51 = arith.truncf %49 : vector<8x8xf32> to vector<8x8xbf16>
    %cst_24 = arith.constant dense<0.000000e+00> : vector<8x8xf32>
    %52 = tpu.matmul %51, %50, %cst_24 {dimension_numbers = #tpu.dot_dimension_numbers<[1], [0], [0], [1], [0, 0, 1, 1], [], []>} : vector<8x8xbf16>, vector<8x8xbf16>, vector<8x8xf32> -> vector<8x8xf32>
    %53 = vector.extract_strided_slice %8 {offsets = [0, 16], sizes = [8, 8], strides = [1, 1]} : vector<8x32xbf16> to vector<8x8xbf16>
    %c0_25 = arith.constant 0 : index
    %c16 = arith.constant 16 : index
    %54 = vector.load %arg10[%c0_25, %c16] : memref<8x64xbf16, #tpu.memory_space<vmem>>, vector<8x8xbf16>
    %cst_26 = arith.constant dense<0.000000e+00> : vector<8x8xf32>
    %55 = tpu.matmul %53, %54, %cst_26 {dimension_numbers = #tpu.dot_dimension_numbers<[1], [1], [0], [0], [0, 0, 1, 0], [], []>} : vector<8x8xbf16>, vector<8x8xbf16>, vector<8x8xf32> -> vector<8x8xf32>
    %cst_27 = arith.constant -1.000000e+30 : f32
    %56 = vector.broadcast %cst_27 : f32 to vector<8x8xf32>
    %57 = arith.select %12, %56, %55 : vector<8x8xi1>, vector<8x8xf32>
    %cst_28 = arith.constant dense<0xFF800000> : vector<8xf32>
    %58 = vector.multi_reduction <maximumf>, %57, %cst_28 [1] : vector<8x8xf32> to vector<8xf32>
    %59 = vector.shape_cast %58 : vector<8xf32> to vector<8x1xf32>
    %60 = vector.broadcast %59 : vector<8x1xf32> to vector<8x8xf32>
    %61 = arith.subf %57, %60 : vector<8x8xf32>
    %62 = math.exp %61 : vector<8x8xf32>
    %cst_29 = arith.constant dense<0.000000e+00> : vector<8xf32>
    %63 = vector.multi_reduction <add>, %62, %cst_29 [1] : vector<8x8xf32> to vector<8xf32>
    %64 = vector.shape_cast %63 : vector<8xf32> to vector<8x1xf32>
    %65 = tpu.reciprocal %64 {approx = true} : vector<8x1xf32> -> vector<8x1xf32>
    %66 = vector.broadcast %65 : vector<8x1xf32> to vector<8x8xf32>
    %67 = arith.mulf %62, %66 : vector<8x8xf32>
    %cst_30 = arith.constant 0.000000e+00 : f32
    %68 = vector.broadcast %cst_30 : f32 to vector<8x8xf32>
    %69 = arith.select %12, %68, %67 : vector<8x8xi1>, vector<8x8xf32>
    %c0_31 = arith.constant 0 : index
    %c48 = arith.constant 48 : index
    %70 = vector.load %arg10[%c0_31, %c48] : memref<8x64xbf16, #tpu.memory_space<vmem>>, vector<8x8xbf16>
    %71 = arith.truncf %69 : vector<8x8xf32> to vector<8x8xbf16>
    %cst_32 = arith.constant dense<0.000000e+00> : vector<8x8xf32>
    %72 = tpu.matmul %71, %70, %cst_32 {dimension_numbers = #tpu.dot_dimension_numbers<[1], [0], [0], [1], [0, 0, 1, 1], [], []>} : vector<8x8xbf16>, vector<8x8xbf16>, vector<8x8xf32> -> vector<8x8xf32>
    %73 = vector.extract_strided_slice %8 {offsets = [0, 24], sizes = [8, 8], strides = [1, 1]} : vector<8x32xbf16> to vector<8x8xbf16>
    %c0_33 = arith.constant 0 : index
    %c24 = arith.constant 24 : index
    %74 = vector.load %arg10[%c0_33, %c24] : memref<8x64xbf16, #tpu.memory_space<vmem>>, vector<8x8xbf16>
    %cst_34 = arith.constant dense<0.000000e+00> : vector<8x8xf32>
    %75 = tpu.matmul %73, %74, %cst_34 {dimension_numbers = #tpu.dot_dimension_numbers<[1], [1], [0], [0], [0, 0, 1, 0], [], []>} : vector<8x8xbf16>, vector<8x8xbf16>, vector<8x8xf32> -> vector<8x8xf32>
    %cst_35 = arith.constant -1.000000e+30 : f32
    %76 = vector.broadcast %cst_35 : f32 to vector<8x8xf32>
    %77 = arith.select %12, %76, %75 : vector<8x8xi1>, vector<8x8xf32>
    %cst_36 = arith.constant dense<0xFF800000> : vector<8xf32>
    %78 = vector.multi_reduction <maximumf>, %77, %cst_36 [1] : vector<8x8xf32> to vector<8xf32>
    %79 = vector.shape_cast %78 : vector<8xf32> to vector<8x1xf32>
    %80 = vector.broadcast %79 : vector<8x1xf32> to vector<8x8xf32>
    %81 = arith.subf %77, %80 : vector<8x8xf32>
    %82 = math.exp %81 : vector<8x8xf32>
    %cst_37 = arith.constant dense<0.000000e+00> : vector<8xf32>
    %83 = vector.multi_reduction <add>, %82, %cst_37 [1] : vector<8x8xf32> to vector<8xf32>
    %84 = vector.shape_cast %83 : vector<8xf32> to vector<8x1xf32>
    %85 = tpu.reciprocal %84 {approx = true} : vector<8x1xf32> -> vector<8x1xf32>
    %86 = vector.broadcast %85 : vector<8x1xf32> to vector<8x8xf32>
    %87 = arith.mulf %82, %86 : vector<8x8xf32>
    %cst_38 = arith.constant 0.000000e+00 : f32
    %88 = vector.broadcast %cst_38 : f32 to vector<8x8xf32>
    %89 = arith.select %12, %88, %87 : vector<8x8xi1>, vector<8x8xf32>
    %c0_39 = arith.constant 0 : index
    %c56 = arith.constant 56 : index
    %90 = vector.load %arg10[%c0_39, %c56] : memref<8x64xbf16, #tpu.memory_space<vmem>>, vector<8x8xbf16>
    %91 = arith.truncf %89 : vector<8x8xf32> to vector<8x8xbf16>
    %cst_40 = arith.constant dense<0.000000e+00> : vector<8x8xf32>
    %92 = tpu.matmul %91, %90, %cst_40 {dimension_numbers = #tpu.dot_dimension_numbers<[1], [0], [0], [1], [0, 0, 1, 1], [], []>} : vector<8x8xbf16>, vector<8x8xbf16>, vector<8x8xf32> -> vector<8x8xf32>
    %93 = tpu.concatenate %32, %52, %72, %92 in 1 : vector<8x8xf32>, vector<8x8xf32>, vector<8x8xf32>, vector<8x8xf32> -> vector<8x32xf32>
    %94 = arith.truncf %93 : vector<8x32xf32> to vector<8x32xbf16>
    %c0_41 = arith.constant 0 : index
    %c0_42 = arith.constant 0 : index
    %95 = vector.load %arg6[%c0_41, %c0_42] : memref<32x32xbf16, #tpu.memory_space<vmem>>, vector<32x32xbf16>
    %cst_43 = arith.constant dense<0.000000e+00> : vector<8x32xf32>
    %96 = tpu.matmul %94, %95, %cst_43 {dimension_numbers = #tpu.dot_dimension_numbers<[1], [0], [0], [1], [0, 0, 1, 1], [], []>} : vector<8x32xbf16>, vector<32x32xbf16>, vector<8x32xf32> -> vector<8x32xf32>
    %97 = arith.addf %4, %96 : vector<8x32xf32>
    %cst_44 = arith.constant 0.000000e+00 : f32
    %98 = vector.broadcast %cst_44 : f32 to vector<8x32xf32>
    %99 = arith.maximumf %97, %98 : vector<8x32xf32>
    %100 = arith.truncf %99 : vector<8x32xf32> to vector<8x32xbf16>
    %c0_45 = arith.constant 0 : index
    %c0_46 = arith.constant 0 : index
    %c0_47 = arith.constant 0 : index
    %101 = vector.load %arg7[%c0_45, %c0_46, %c0_47] : memref<1x8x32xbf16, #tpu.memory_space<vmem>>, vector<1x8x32xbf16>
    %102 = vector.shape_cast %101 : vector<1x8x32xbf16> to vector<8x32xbf16>
    %103 = vector.shape_cast %100 : vector<8x32xbf16> to vector<1x8x32xbf16>
    tpu.vector_store %arg7[%c0_45, %c0_46, %c0_47], %103 {strides = array<i32>} : memref<1x8x32xbf16, #tpu.memory_space<vmem>>, vector<1x8x32xbf16>,
    %c0_48 = arith.constant 0 : index
    %c0_49 = arith.constant 0 : index
    %c0_50 = arith.constant 0 : index
    %104 = vector.load %arg8[%c0_48, %c0_49, %c0_50] : memref<1x1x32xf32, #tpu.memory_space<vmem>>, vector<1x1x32xf32>
    %105 = vector.shape_cast %104 : vector<1x1x32xf32> to vector<1x32xf32>
    %cst_51 = arith.constant dense<0.000000e+00> : vector<32xf32>
    %106 = vector.multi_reduction <add>, %99, %cst_51 [0] : vector<8x32xf32> to vector<32xf32>
    %107 = vector.shape_cast %106 : vector<32xf32> to vector<1x32xf32>
    %108 = arith.addf %105, %107 : vector<1x32xf32>
    %c0_52 = arith.constant 0 : index
    %c0_53 = arith.constant 0 : index
    %c0_54 = arith.constant 0 : index
    %109 = vector.load %arg8[%c0_52, %c0_53, %c0_54] : memref<1x1x32xf32, #tpu.memory_space<vmem>>, vector<1x1x32xf32>
    %110 = vector.shape_cast %109 : vector<1x1x32xf32> to vector<1x32xf32>
    %111 = vector.shape_cast %108 : vector<1x32xf32> to vector<1x1x32xf32>
    tpu.vector_store %arg8[%c0_52, %c0_53, %c0_54], %111 {strides = array<i32>} : memref<1x1x32xf32, #tpu.memory_space<vmem>>, vector<1x1x32xf32>,
    %c0_55 = arith.constant 0 : index
    %c0_56 = arith.constant 0 : index
    %c0_57 = arith.constant 0 : index
    %112 = vector.load %arg9[%c0_55, %c0_56, %c0_57] : memref<1x1x32xf32, #tpu.memory_space<vmem>>, vector<1x1x32xf32>
    %113 = vector.shape_cast %112 : vector<1x1x32xf32> to vector<1x32xf32>
    %114 = arith.mulf %99, %99 : vector<8x32xf32>
    %cst_58 = arith.constant dense<0.000000e+00> : vector<32xf32>
    %115 = vector.multi_reduction <add>, %114, %cst_58 [0] : vector<8x32xf32> to vector<32xf32>
    %116 = vector.shape_cast %115 : vector<32xf32> to vector<1x32xf32>
    %117 = arith.addf %113, %116 : vector<1x32xf32>
    %c0_59 = arith.constant 0 : index
    %c0_60 = arith.constant 0 : index
    %c0_61 = arith.constant 0 : index
    %118 = vector.load %arg9[%c0_59, %c0_60, %c0_61] : memref<1x1x32xf32, #tpu.memory_space<vmem>>, vector<1x1x32xf32>
    %119 = vector.shape_cast %118 : vector<1x1x32xf32> to vector<1x32xf32>
    %120 = vector.shape_cast %117 : vector<1x32xf32> to vector<1x1x32xf32>
    tpu.vector_store %arg9[%c0_59, %c0_60, %c0_61], %120 {strides = array<i32>} : memref<1x1x32xf32, #tpu.memory_space<vmem>>, vector<1x1x32xf32>,
    return
  }
  func.func @transform_0(%arg0: i32, %arg1: i32) -> (i32, i32, i32) {
    %c0_i32 = arith.constant 0 : i32
    %c0_i32_0 = arith.constant 0 : i32
    return %arg0, %arg1, %c0_i32 : i32, i32, i32
  }
  func.func @transform_1(%arg0: i32, %arg1: i32) -> (i32, i32, i32) {
    %c0_i32 = arith.constant 0 : i32
    %c0_i32_0 = arith.constant 0 : i32
    %c0_i32_1 = arith.constant 0 : i32
    return %arg0, %c0_i32, %c0_i32_0 : i32, i32, i32
  }
  func.func @transform_2(%arg0: i32, %arg1: i32) -> (i32, i32, i32) {
    %c0_i32 = arith.constant 0 : i32
    %c0_i32_0 = arith.constant 0 : i32
    return %arg0, %arg1, %c0_i32 : i32, i32, i32
  }
  func.func @transform_3(%arg0: i32, %arg1: i32) -> (i32, i32) {
    %c0_i32 = arith.constant 0 : i32
    %c0_i32_0 = arith.constant 0 : i32
    %c0_i32_1 = arith.constant 0 : i32
    return %c0_i32, %c0_i32_0 : i32, i32
  }
  func.func @transform_4(%arg0: i32, %arg1: i32) -> (i32, i32) {
    %c0_i32 = arith.constant 0 : i32
    %c0_i32_0 = arith.constant 0 : i32
    %c0_i32_1 = arith.constant 0 : i32
    return %c0_i32, %c0_i32_0 : i32, i32
  }
  func.func @transform_5(%arg0: i32, %arg1: i32) -> (i32, i32, i32) {
    %c0_i32 = arith.constant 0 : i32
    %c0_i32_0 = arith.constant 0 : i32
    return %arg0, %arg1, %c0_i32 : i32, i32, i32
  }
  func.func @transform_6(%arg0: i32, %arg1: i32) -> (i32, i32, i32) {
    %c0_i32 = arith.constant 0 : i32
    %c0_i32_0 = arith.constant 0 : i32
    %c0_i32_1 = arith.constant 0 : i32
    return %arg0, %c0_i32, %c0_i32_0 : i32, i32, i32
  }
  func.func @transform_7(%arg0: i32, %arg1: i32) -> (i32, i32, i32) {
    %c0_i32 = arith.constant 0 : i32
    %c0_i32_0 = arith.constant 0 : i32
    %c0_i32_1 = arith.constant 0 : i32
    return %arg0, %c0_i32, %c0_i32_0 : i32, i32, i32
  }
}

</mosaic_0001>

<bundles_post_ra>
// kernel: tpu_custom_call.1
= control target key start
LH: loop header
LB: loop body
LE: loop exit
PB: predicated region body
PF: predicated region fallthrough
CT: control target
= control target key end

     0   :  { %s1981_s0 = inlined_call_operand.hbm [shape: f32[2,8,32], index: 0, kind: input, shape index: {}]   ;;  %s1982_s1 = inlined_call_operand.hbm [shape: f32[2,8,32], index: 1, kind: input, shape index: {}]   ;;  %s1983_s2 = inlined_call_operand.hbm [shape: s8[2,8,8], index: 2, kind: input, shape index: {}]   ;;  %s1984_s3 = inlined_call_operand.hbm [shape: bf16[32,96], index: 3, kind: input, shape index: {}]   ;;  %s1985_s4 = inlined_call_operand.hbm [shape: bf16[32,32], index: 4, kind: input, shape index: {}]   ;;  %s1986_s5 = inlined_call_operand.hbm [shape: bf16[2,8,32], index: 5, kind: output, shape index: {0}]   ;;  %s1987_s6 = inlined_call_operand.hbm [shape: f32[2,1,32], index: 6, kind: output, shape index: {1}]   ;;  %s1988_s7 = inlined_call_operand.hbm [shape: f32[2,1,32], index: 7, kind: output, shape index: {2}]  }
   0x1   :  { %2000 = sst [smem:[#allocation27_spill]] %s1982_s1 }
   0x2   :  { %2001 = sst [smem:[#allocation28_spill]] %s1984_s3 }
   0x3   :  { %2002 = sst [smem:[#allocation29_spill]] %s1985_s4 }
   0x4   :  { %2003 = sst [smem:[#allocation30_spill]] %s1987_s6 }
   0x5   :  { %2004 = sst [smem:[#allocation31_spill]] %s1988_s7 }
   0x6   :  { %13 = vsyncpa [#allocation4], 0 }
   0x7   :  { %15 = vsyncpa [#allocation4 + $0x1], 0 }
   0x8   :  { %16 = vsyncpa [#allocation7], 0 }
   0x9   :  { %18 = vsyncpa [#allocation7 + $0x1], 0 }
   0xa   :  { %19 = vsyncpa [#allocation10], 0 }
   0xb   :  { %20 = vsyncpa [#allocation5], 0 }
   0xc   :  { %22 = vsyncpa [#allocation5 + $0x1], 0 }
   0xd   :  { %23 = vsyncpa [#allocation14], 0 }
   0xe   :  { %25 = vsyncpa [#allocation14 + $0x1], 0  ;;  %s1649_s24 = smov 0   ;;  %s1651_s25 = smov 0  }
   0xf   :  { %s1653_s26 = smov 0   ;;  %s1655_s27 = smov 0  }
  0x10   :  { %s1657_s28 = smov 0   ;;  %s1659_s29 = smov 0  }
  0x11 LB: > { %2005 = sst [smem:[#allocation21_spill]] %s1571_s24  ;;  %s1680_s30 = sadd.s32 4294967295, %s1591_s29   ;;  %s1591_s29 = sphi %s1659_s29, %s31_s29   ;;  %s1587_s28 = sphi %s1657_s28, %s2039_s28   ;;  %s1583_s27 = sphi %s1655_s27, %s2038_s27   ;;  %s1579_s26 = sphi %s1653_s26, %s2034_s26   ;;  %s1575_s25 = sphi %s1651_s25, %s2037_s25   ;;  %s1571_s24 = sphi %s1649_s24, %s2036_s24  }
  0x12   : > { %2006 = sst [smem:[#allocation22_spill]] %s1579_s26  ;;  %p1096_p0 = scmp.ge.s32.totalorder %s1591_s29, 1 }
  0x13   : > { %2007 = sst [smem:[#allocation23_spill]] %s1591_s29  ;;  %p66_p1 = scmp.eq.s32.totalorder %s1680_s30, 0 }
  0x14   : > { %p252_p2 = scmp.lt.s32.totalorder %s1591_s29, 3  ;;  %s2008_s3 = sld [smem:[#allocation28_spill]] }
  0x15   : > { %s1593_s12 = smov [#allocation9]   ;;  %s1990_s15 = smov 64  }
  0x16   : > { %p1688_p3 = pnand %p1096_p0, %p252_p2  ;;  %s265_s13 = sshll.u32 %s1593_s12, 4  ;;  %s266_s13 = int_to_ptr.vmem [resolvable:$true] %s265_s13 }
  0x17   : > { %s1991_s16 = smov 4   ;;  %s1989_s17 = sadd.s32 4294967294, %s1591_s29  }
  0x18   : > { %p1178_p4 = pneg %p1688_p3  ;;  %s43_s18 = sadd.s32 1, %s1587_s28 }
  0x19   : > { %s52_s19 = sadd.s32 1, %s1579_s26  ;;  %p45_p7 = scmp.ge.s32.totalorder %s43_s18, 2 }
  0x1a   : > { %s263_s10 = sshll.u32 %s2008_s3, 4  ;;  %p1696_p5 = pnand %p1178_p4, %p66_p1  ;;  %s264_s10 = int_to_ptr.hbm [resolvable:$true] %s263_s10 }
  0x1b   : > { %p59_p8 = scmp.ne.s32.totalorder %s1579_s26, %s1575_s25  ;;  %p60_p9 = scmp.eq.s32.totalorder %s1591_s29, 0 }
  0x1c   : > { %1181 = dma.hbm_to_vmem [thread:$0]  (!%p1696_p5), %s264_s10, 256, %s266_s13, [#allocation10], %s1990_s15, %s1990_s15, %s1991_s16  }
  0x1d   : > { %p65_p10 = scmp.ne.s32.totalorder %s1575_s25, %s1571_s24  ;;  %s2041_s18 = smov (%p45_p7, %s43_s18), 0 }
  0x1e   : > { %2011 = sst [smem:[#allocation24_spill]] %s2041_s18  ;;  %p1716_p11 = por %p60_p9, %p59_p8 }
  0x1f   : > { %p1722_p12 = por %p66_p1, %p65_p10  ;;  %s47_s22 = ssub.s32 %s1587_s28, %s2041_s18 }
  0x20   : > { %p187_p13 = scmp.eq.s32.totalorder %s1680_s30, 1  ;;  %p50_p0 = scmp.eq.s32.totalorder %s47_s22, 0 }
  0x21   : > { %p193_p2 = scmp.eq.s32.totalorder %s1989_s17, 1  ;;  %p1207_p7 = scmp.lt.s32.totalorder %s1591_s29, 2 }
  0x22   : > { %p1731_p4 = por %p187_p13, %p59_p8  ;;  %s1744_s10 = sand.u32 1, %s1579_s26  }
  0x23   : > { %s1737_s8 = scalar_select %p50_p0, %s1579_s26, %s52_s19  }
  0x24   : > { %p1739_p9 = por %p193_p2, %p65_p10  ;;  %s1100_s12 = sshll.u32 %s1744_s10, 3 }
  0x25   : > { %2015 = sst [smem:[#allocation25_spill]] %s1737_s8  ;;  %s1101_s13 = sshll.u32 %s1587_s28, 3 }
  0x26   : > { %s2016_s9 = scalar_select %p1739_p9, 1, 0 }
  0x27   : > { %p1750_p6 = pnand %p1207_p7, %p1716_p11  ;;  %s313_s17 = sand.u32 1, %s1591_s29  }
  0x28   : > { %2017 = sst [smem:[#allocation26_spill]] %s2016_s9  ;;  %s317_s18 = scalar_lea.vmem [#allocation6], %s1100_s12 }
  0x29   : > { %s2019_s1 = sld [smem:[#allocation27_spill]]  ;;  %s325_s8 = sshll.u32 %s317_s18, 4  ;;  %s326_s8 = int_to_ptr.vmem [resolvable:$true] %s325_s8 }
  0x2a   : > { %s314_s26 = scalar_lea.sflag [#allocation7], %s313_s17  ;;  %s2020_s4 = sld [smem:[#allocation29_spill]] }
  0x2b   : > { %s1596_s24 = smov [#allocation11]   ;;  %s2022_s18 = smov 64  }
  0x2c   : > { %s279_s15 = sshll.u32 %s1596_s24, 4  ;;  %s302_s17 = scalar_lea.hbm %s1981_s0, %s1101_s13  ;;  %s280_s15 = int_to_ptr.vmem [resolvable:$true] %s279_s15 }
  0x2d   : > { %s294_s9 = scalar_lea.sflag [#allocation4], %s1744_s10  ;;  %s1104_s24 = sshll.u32 %s1744_s10, 1 }
  0x2e   : > { %s1105_s20 = sshll.u32 %s1587_s28, 1 }
  0x2f   : > { %s321_s16 = scalar_lea.hbm %s2019_s1, %s1101_s13  ;;  %s341_s6 = scalar_lea.hbm %s1983_s2, %s1105_s20 }
  0x30   : > { %s323_s3 = sshll.u32 %s321_s16, 4  ;;  %s277_s29 = sshll.u32 %s2020_s4, 4  ;;  %s324_s3 = int_to_ptr.hbm [resolvable:$true] %s323_s3  ;;  %s278_s29 = int_to_ptr.hbm [resolvable:$true] %s277_s29 }
  0x31   : > { %1191 = dma.hbm_to_vmem [thread:$0]  (!%p1750_p6), %s324_s3, 128, %s326_s8, %s314_s26  }
  0x32   : > { %s2021_s16 = smov 4   ;;  %s304_s3 = sshll.u32 %s302_s17, 4  ;;  %s305_s3 = int_to_ptr.hbm [resolvable:$true] %s304_s3 }
  0x33   : > { %1184 = dma.hbm_to_vmem [thread:$0]  (!%p1696_p5), %s278_s29, 256, %s280_s15, [#allocation10], %s2022_s18, %s2022_s18, %s2021_s16  }
  0x34   : > { %s297_s8 = scalar_lea.vmem [#allocation3], %s1100_s12  ;;  %s343_s29 = sshll.u32 %s341_s6, 4  ;;  %s344_s29 = int_to_ptr.hbm [resolvable:$true] %s343_s29 }
  0x35   : > { %s306_s7 = sshll.u32 %s297_s8, 4  ;;  %s336_s15 = scalar_lea.vmem [#allocation8], %s1104_s24  ;;  %s307_s7 = int_to_ptr.vmem [resolvable:$true] %s306_s7 }
  0x36   : > { %1188 = dma.hbm_to_vmem [thread:$0]  (!%p1750_p6), %s305_s3, 128, %s307_s7, %s294_s9  }
  0x37   : > { %s345_s16 = sshll.u32 %s336_s15, 4  ;;  %354 = sbr.rel (%p1688_p3) target bundleno = 1579 (0x62b), region = 40  ;;  %s346_s16 = int_to_ptr.vmem [resolvable:$true] %s345_s16 }
  0x38   : > { %1194 = dma.hbm_to_vmem [thread:$0]  (!%p1750_p6), %s344_s29, 32, %s346_s16, %s314_s26  }
  0x39   : > { %s1784_s1 = sand.u32 (!%p1688_p3), 1, %s1575_s25  }
  0x3a   : > { %s1107_s7 = sshll.u32 (!%p1688_p3), %s1784_s1, 3  ;;  %s357_s10 = scalar_lea.sflag (!%p1688_p3), [#allocation4], %s1784_s1 }
  0x3b   : > { %s360_s4 = scalar_lea.vmem (!%p1688_p3), [#allocation3], %s1107_s7 }
  0x3c   : > { %1550 = dma.done.wait (%p1722_p12), %s357_s10, 128  }
  0x3d   : > { %1552 = vsyncadd (%p1722_p12), %s357_s10, 4294967168  ;;  %s366_s6 = sand.u32 1, %s1680_s30   ;;  %s370_s11 = scalar_lea.vmem [#allocation6], %s1107_s7 }
  0x3e   : > { %s367_s26 = scalar_lea.sflag [#allocation7], %s366_s6 }
  0x3f   : > { %1554 = dma.done.wait (%p1722_p12), %s367_s26, 160  }
  0x40   : > { %1556 = vsyncadd (%p1722_p12), %s367_s26, 4294967136  ;;  %s1109_s12 = sshll.u32 %s1784_s1, 1 }
  0x41   : > { %s1800_s13 = scalar_lea.vmem [#allocation8], %s1109_s12 }
  0x42   : > { %1558 = dma.done.wait (%p66_p1), [#allocation10], 512  }
  0x43   : > { %1560 = vsyncadd (%p66_p1), [#allocation10], 4294966784  ;;  %v1153_v0 = vld [vmem:[#allocation9 + $0x8] sm:$0xff]  ;;  %s1597_s22 = smov 96   ;;  %v1152_v1 = vld [vmem:[#allocation9] sm:$0xff]  ;;  %vm469_vm0 = vcmask 261120  }
  0x44   : > { %465 = vrot.lane.b32.xlu0 %v1153_v0, %s1597_s22  ;;  %v1155_v2 = vld [vmem:[#allocation9 + $0x8] sm:$0xff]  ;;  %v1154_v3 = vld [vmem:[#allocation9] sm:$0xff]  ;;  %s1598_s21 = smov 120   ;;  %s1599_s18 = smov 112   ;;  %vm487_vm1 = vcmask 519168   ;;  %vm531_vm2 = vcmask 64512  }
  0x45   : > { %520 = vmatpush.bf16.msra.mxu1 %v1155_v2  ;;  %v1808_v4 = vld [vmem:[%s360_s4] sm:$0xff]  ;;  %v447_v7 = vld [vmem:[%s370_s11] sm:$0xff]  ;;  %s1600_s19 = smov 104   ;;  %vm576_vm3 = vcmask 1043456   ;;  %v1601_v27 = vmov 0   ;;  %s1602_s17 = smov 88  }
  0x46   : > { %v493_v5 = vpack.c.bf16 %v1808_v4, %v1808_v4  ;;  %v448_v9 = vpack.c.bf16 %v447_v7, %v447_v7  ;;  %v528_v26 = vld [vmem:[%s1800_s13] sm:$0x3]  ;;  %s1603_s3 = smov 80   ;;  %s1604_s8 = smov 72   ;;  %vm783_vm6 = vcmask 130048   ;;  %vm785_vm7 = vcmask 195584  }
  0x47   : > { %vm529_vm4 = vnez %v528_v26  ;;  %s1605_s9 = smov 16   ;;  %s1606_s24 = smov 8   ;;  %vm489_vm8 = vcmask 253952   ;;  %vm823_vm9 = vcmask 257024  }
  0x48   : > { %v551_v28 = vsel %vm529_vm4, 16843009, %v1601_v27  ;;  %s1607_s20 = smov 24   ;;  %s1877_s14 = scalar_lea.vmem [#allocation13], %s1784_s1 }
  0x49   : > { %521 = vmatpush.bf16.msra.mxu1 %v1154_v3  ;;  %v552_v29 = vunpack.c.0.s8 %v551_v28  ;;  %s1882_s29 = scalar_lea.vmem [#allocation15], %s1784_s1  ;;  %s1149_s15 = sshll.u32 %s1583_s27, 2 }
  0x4a   : > { %s1112_s16 = sshll.u32 %s1784_s1, 2  ;;  %s867_s4 = scalar_lea.hbm %s1986_s5, %s1149_s15 }
  0x4b   : > { %vm1826_vm5 = vcmp.ne.s32.totalorder %v552_v29, 0  ;;  %s427_s26 = scalar_lea.vmem [#allocation12], %s1112_s16  ;;  %s871_s12 = sshll.u32 %s867_s4, 4  ;;  %s872_s12 = int_to_ptr.hbm [resolvable:$true] %s871_s12 }
  0x4c   : > { %463 = vrot.lane.b32.xlu0 %v1152_v1, %s1597_s22  ;;  %1130 = vmatmul.msk.bf16.vlgmr.msra.gmra.mxu1 %vm469_vm0, %v493_v5  ;;  %s869_s11 = sshll.u32 %s427_s26, 4  ;;  %s848_s13 = scalar_lea.sflag [#allocation5], %s1784_s1  ;;  %s870_s11 = int_to_ptr.vmem [resolvable:$true] %s869_s11 }
  0xb6   : > { %v466_v6 = vpop.permute.xlu0 %465 }
  0xb7   : > { %479 = vmatpush.bf16.msra.mxu0 %v466_v6 }
  0xbe   : > { %v464_v8 = vpop.permute.xlu0 %463 }
  0xbf   : > { %480 = vmatpush.bf16.msra.mxu0 %v464_v8 }
  0xc2   : > { %1121 = vmatmul.msk.bf16.vlgmr.msra.gmra.mxu0 %vm469_vm0, %v448_v9 }
  0xc9   : > { %v523_v10 = vpop.f32.mrf.mxu1 }
  0xca   : > { %v527_v11 = vpack.c.bf16 %v523_v10, %v523_v10 }
  0xcc   : > { %v594_v12 = vunpack.c.l.b16 %v527_v11 }
  0xce   : > { %v595_v13 = vpack.c.b16 %v594_v12, %v594_v12 }
  0xd0   : > { %596 = vrot.lane.b32.xlu0 %v595_v13, %s1598_s21 }
  0xd1   : > { %v525_v14 = vpop.f32.mrf.mxu1 }
  0xd8   : > { %654 = vrot.lane.b32.xlu0 %v595_v13, %s1599_s18 }
 0x13f   : > { %v482_v15 = vpop.f32.mrf.mxu0 }
 0x140   : > { %v486_v16 = vpack.c.bf16 %v482_v15, %v482_v15 }
 0x142   : > { %488 = vst.msk [vmem:[#allocation2] sm:$0xf] %vm487_vm1, %v486_v16  ;;  %v597_v47 = vpop.permute.xlu0 %596 }
 0x147   : > { %v484_v17 = vpop.f32.mrf.mxu0 }
 0x149   : > { %v530_v18 = vld [vmem:[#allocation2] sm:$0xf] }
 0x14a   : > { %v536_v19 = vsel %vm531_vm2, %v530_v18, 0  ;;  %v569_v20 = vunpack.c.l.b16 %v530_v18  ;;  %v655_v50 = vpop.permute.xlu0 %654 }
 0x14b   : > { %545 = vmatpush.bf16.xpose.msra.mxu2 %v536_v19 }
 0x14c   : > { %v1816_v21 = vpack.c.b16 %v569_v20, %v569_v20 }
 0x14e   : > { %571 = vrot.lane.b32.xlu2 %v1816_v21, %s1597_s22  ;;  %s1455_s22 = sshra.s32 %s872_s12, 4  ;;  %s1456_s22 = int_to_ptr.hbm [resolvable:$true] %s1455_s22 }
 0x14f   : > { %p1462_p6 = scmp.lt.s32.totalorder %s1456_s22, %s1986_s5 }
 0x152   : > { %1131 = vmatmul.msk.bf16.vlgmr.msra.gmra.mxu2 %vm531_vm2, %v527_v11 }
 0x156   : > { %598 = vrot.lane.b32.xlu2 %v1816_v21, %s1598_s21  ;;  %s1457_s21 = scalar_lea.hbm %s1456_s22, 4 }
 0x157   : > { %p1458_p1 = scmp.ne.s32.totalorder %s1456_s22, %s1457_s21 }
 0x159   : > { %p1459_p3 = pnand %p1458_p1, %p1731_p4 }
 0x15b   : > { %p1460_p5 = pneg %p1459_p3 }
 0x15e   : > { %714 = vrot.lane.b32.xlu2 %v1816_v21, %s1600_s19 }
 0x166   : > { %712 = vrot.lane.b32.xlu2 %v595_v13, %s1600_s19 }
 0x1a8   : > { %v572_v22 = vpop.permute.xlu2 %571 }
 0x1a9   : > { %v578_v23 = vsel %vm576_vm3, %v572_v22, 0 }
 0x1aa   : > { %587 = vmatpush.bf16.msra.mxu3 %v578_v23 }
 0x1b0   : > { %v599_v24 = vpop.permute.xlu2 %598 }
 0x1b1   : > { %v604_v25 = vsel %vm531_vm2, %v599_v24, 0 }
 0x1b2   : > { %613 = vmatpush.bf16.xpose.msrb.mxu3 %v604_v25 }
 0x1b8   : > { %v715_v43 = vpop.permute.xlu2 %714 }
 0x1b9   : > { %v720_v46 = vsel %vm531_vm2, %v715_v43, 0 }
 0x1c0   : > { %v713_v51 = vpop.permute.xlu2 %712 }
 0x1d5   : > { %v547_v31 = vpop.f32.mrf.mxu2 }
 0x1d6   : > { %v554_v32 = vsel %vm1826_vm5, -1e+30, %v547_v31 }
 0x1d7   : > { %v555_v33 = vsel %vm531_vm2, %v554_v32, -inf }
 0x1d8   : > { %556 = vmax.xlane.f32.xlu1 %v555_v33 }
 0x1dd   : > { %v549_v34 = vpop.f32.mrf.mxu2 }
 0x24b   : > { %v557_v35 = vpop.xlane.xlu1 %556 }
 0x24c   : > { %v558_v36 = vsub.f32 %v554_v32, %v557_v35 }
 0x24e   : > { %v559_v37 = vmul.f32 1.442695, %v558_v36 }
 0x250   : > { %1275 = vpow2.f32 %v559_v37 }
 0x256   : > { %v1276_v38 = vpop.eup %1275 }
 0x257   : > { %v561_v39 = vsel %vm531_vm2, %v1276_v38, 0.0 }
 0x258   : > { %562 = vadd.xlane.f32.xlu1 %v561_v39 }
 0x271   : > { %656 = vrot.lane.b32.xlu1 %v1816_v21, %s1599_s18 }
 0x2cb   : > { %v563_v40 = vpop.xlane.xlu1 %562 }
 0x2cc   : > { %1277 = vrcp.f32 %v563_v40 }
 0x2d2   : > { %v1278_v41 = vpop.eup %1277 }
 0x2d3   : > { %v565_v42 = vmul.f32 %v1278_v41, %v1276_v38 }
 0x2d5   : > { %v566_v44 = vsel %vm1826_vm5, 0.0, %v565_v42 }
 0x2d6   : > { %v567_v45 = vpack.c.bf16 %v566_v44, %v566_v44 }
 0x2d8   : > { %1132 = vmatmul.msk.bf16.vlgmr.msra.gmra.mxu3 %vm531_vm2, %v567_v45  ;;  %v1157_v45 = vld [vmem:[#allocation11 + $0x8] sm:$0xff] }
 0x2d9   : > { %729 = vmatpush.bf16.xpose.msra.mxu3 %v720_v46  ;;  %v1156_v46 = vld [vmem:[#allocation11] sm:$0xff] }
 0x2e3   : > { %v657_v48 = vpop.permute.xlu1 %656 }
 0x2e4   : > { %v662_v49 = vsel %vm531_vm2, %v657_v48, 0 }
 0x2e5   : > { %671 = vmatpush.bf16.xpose.msrb.mxu1 %v662_v49 }
 0x2e8   : > { %1133 = vmatmul.msk.bf16.vlgmr.msrb.gmra.mxu3 %vm531_vm2, %v597_v47 }
 0x2ec   : > { %1135 = vmatmul.msk.bf16.vlgmr.msrb.gmra.mxu1 %vm531_vm2, %v655_v50 }
 0x2ed   : > { %813 = vmatpush.bf16.msra.mxu1 %v1157_v45 }
 0x2f1   : > { %814 = vmatpush.bf16.msra.mxu1 %v1156_v46 }
 0x2f8   : > { %1137 = vmatmul.msk.bf16.vlgmr.msra.gmra.mxu3 %vm531_vm2, %v713_v51 }
 0x35b   : > { %v1844_v52 = vpop.f32.mrf.mxu3 }
 0x363   : > { %v591_v53 = vpop.f32.mrf.mxu3 }
 0x369   : > { %v673_v54 = vpop.f32.mrf.mxu1 }
 0x36a   : > { %v677_v55 = vsel %vm1826_vm5, -1e+30, %v673_v54 }
 0x36b   : > { %v615_v56 = vpop.f32.mrf.mxu3  ;;  %v678_v57 = vsel %vm531_vm2, %v677_v55, -inf }
 0x36c   : > { %v619_v58 = vsel %vm1826_vm5, -1e+30, %v615_v56  ;;  %679 = vmax.xlane.f32.xlu2 %v678_v57 }
 0x36d   : > { %v620_v59 = vsel %vm531_vm2, %v619_v58, -inf }
 0x36e   : > { %621 = vmax.xlane.f32.xlu0 %v620_v59 }
 0x371   : > { %v675_v60 = vpop.f32.mrf.mxu1 }
 0x373   : > { %v617_v61 = vpop.f32.mrf.mxu3 }
 0x37b   : > { %v731_v62 = vpop.f32.mrf.mxu3 }
 0x37c   : > { %v735_v63 = vsel %vm1826_vm5, -1e+30, %v731_v62 }
 0x37d   : > { %v736_v0 = vsel %vm531_vm2, %v735_v63, -inf }
 0x37e   : > { %737 = vmax.xlane.f32.xlu1 %v736_v0 }
 0x382   : > { %633 = vrot.lane.b32.xlu0 %v1816_v21, %s1602_s17  ;;  %s1461_s17 = scalar_lea.hbm %s1986_s5, 8 }
 0x383   : > { %v733_v1 = vpop.f32.mrf.mxu3  ;;  %p1463_p8 = scmp.lt.s32.totalorder %s1461_s17, %s1457_s21 }
 0x385   : > { %p1464_p10 = por %p1463_p8, %p1462_p6 }
 0x387   : > { %p1465_p11 = pnand %p1464_p10, %p1460_p5 }
 0x3df   : > { %v680_v2 = vpop.xlane.xlu2 %679 }
 0x3e0   : > { %v681_v3 = vsub.f32 %v677_v55, %v680_v2  ;;  %v1608_v55 = vmov 0.0  }
 0x3e1   : > { %v622_v5 = vpop.xlane.xlu0 %621  ;;  %490 = vst.msk [vmem:[%s1877_s14] sm:$0x1] %vm489_vm8, %v1608_v55 }
 0x3e2   : > { %v682_v6 = vmul.f32 1.442695, %v681_v3  ;;  %v623_v7 = vsub.f32 %v619_v58, %v622_v5  ;;  %491 = vst.msk [vmem:[%s1882_s29] sm:$0x1] %vm489_vm8, %v1608_v55 }
 0x3e4   : > { %1279 = vpow2.f32 %v682_v6  ;;  %v624_v8 = vmul.f32 1.442695, %v623_v7 }
 0x3e6   : > { %1281 = vpow2.f32 %v624_v8 }
 0x3ea   : > { %v1280_v9 = vpop.eup %1279 }
 0x3eb   : > { %v684_v10 = vsel %vm531_vm2, %v1280_v9, 0.0 }
 0x3ec   : > { %685 = vadd.xlane.f32.xlu2 %v684_v10  ;;  %v1282_v11 = vpop.eup %1281 }
 0x3ed   : > { %v626_v14 = vsel %vm531_vm2, %v1282_v11, 0.0 }
 0x3f1   : > { %v738_v12 = vpop.xlane.xlu1 %737 }
 0x3f2   : > { %v739_v13 = vsub.f32 %v735_v63, %v738_v12 }
 0x3f4   : > { %v740_v15 = vmul.f32 1.442695, %v739_v13  ;;  %v634_v16 = vpop.permute.xlu0 %633  ;;  %627 = vadd.xlane.f32.xlu2 %v626_v14 }
 0x3f5   : > { %v639_v17 = vsel %vm576_vm3, %v634_v16, 0 }
 0x3f6   : > { %1283 = vpow2.f32 %v740_v15  ;;  %648 = vmatpush.bf16.msrb.mxu0 %v639_v17 }
 0x3fc   : > { %v1284_v18 = vpop.eup %1283 }
 0x3fd   : > { %v742_v19 = vsel %vm531_vm2, %v1284_v18, 0.0 }
 0x3fe   : > { %743 = vadd.xlane.f32.xlu1 %v742_v19 }
 0x40c   : > { %691 = vrot.lane.b32.xlu2 %v1816_v21, %s1603_s3 }
 0x417   : > { %749 = vrot.lane.b32.xlu1 %v1816_v21, %s1604_s8 }
 0x45f   : > { %v686_v20 = vpop.xlane.xlu2 %685 }
 0x460   : > { %1285 = vrcp.f32 %v686_v20 }
 0x466   : > { %v1286_v23 = vpop.eup %1285 }
 0x467   : > { %v628_v22 = vpop.xlane.xlu2 %627  ;;  %v688_v24 = vmul.f32 %v1286_v23, %v1280_v9 }
 0x468   : > { %1287 = vrcp.f32 %v628_v22 }
 0x469   : > { %v689_v28 = vsel %vm1826_vm5, 0.0, %v688_v24 }
 0x46a   : > { %v690_v21 = vpack.c.bf16 %v689_v28, %v689_v28 }
 0x46e   : > { %v1288_v25 = vpop.eup %1287 }
 0x46f   : > { %v630_v26 = vmul.f32 %v1288_v25, %v1282_v11  ;;  %v692_v27 = vpop.permute.xlu2 %691 }
 0x470   : > { %v697_v29 = vsel %vm576_vm3, %v692_v27, 0 }
 0x471   : > { %706 = vmatpush.bf16.msrb.mxu2 %v697_v29  ;;  %v631_v31 = vsel %vm1826_vm5, 0.0, %v630_v26  ;;  %v744_v33 = vpop.xlane.xlu1 %743 }
 0x472   : > { %v632_v32 = vpack.c.bf16 %v631_v31, %v631_v31  ;;  %1289 = vrcp.f32 %v744_v33 }
 0x474   : > { %1134 = vmatmul.msk.bf16.vlgmr.msrb.gmra.mxu0 %vm531_vm2, %v632_v32  ;;  %1136 = vmatmul.msk.bf16.vlgmr.msrb.gmra.mxu2 %vm531_vm2, %v690_v21 }
 0x478   : > { %v1290_v34 = vpop.eup %1289 }
 0x479   : > { %v746_v35 = vmul.f32 %v1290_v34, %v1284_v18 }
 0x47b   : > { %v747_v36 = vsel %vm1826_vm5, 0.0, %v746_v35 }
 0x47c   : > { %v748_v39 = vpack.c.bf16 %v747_v36, %v747_v36 }
 0x489   : > { %v750_v37 = vpop.permute.xlu1 %749 }
 0x48a   : > { %v755_v38 = vsel %vm576_vm3, %v750_v37, 0 }
 0x48b   : > { %764 = vmatpush.bf16.msra.mxu0 %v755_v38 }
 0x48e   : > { %1138 = vmatmul.msk.bf16.vlgmr.msra.gmra.mxu0 %vm531_vm2, %v748_v39 }
 0x4f1   : > { %v650_v40 = vpop.f32.mrf.mxu0 }
 0x4f7   : > { %v708_v41 = vpop.f32.mrf.mxu2 }
 0x4f8   : > { %775 = vrot.lane.b32.xlu0 %v708_v41, %s1605_s9 }
 0x4f9   : > { %v652_v42 = vpop.f32.mrf.mxu0 }
 0x4ff   : > { %v710_v43 = vpop.f32.mrf.mxu2 }
 0x500   : > { %771 = vrot.lane.b32.xlu0 %v650_v40, %s1606_s24 }
 0x50b   : > { %v766_v44 = vpop.f32.mrf.mxu0 }
 0x50c   : > { %779 = vrot.lane.b32.xlu0 %v766_v44, %s1607_s20 }
 0x513   : > { %v768_v30 = vpop.f32.mrf.mxu0 }
 0x56a   : > { %v776_v47 = vpop.permute.xlu0 %775 }
 0x572   : > { %v772_v48 = vpop.permute.xlu0 %771 }
 0x573   : > { %v782_v49 = vsel %vm531_vm2, %v1844_v52, %v772_v48 }
 0x574   : > { %v784_v50 = vsel %vm783_vm6, %v782_v49, %v776_v47 }
 0x57e   : > { %v780_v51 = vpop.permute.xlu0 %779 }
 0x57f   : > { %v786_v53 = vsel %vm785_vm7, %v784_v50, %v780_v51 }
 0x580   : > { %v787_v54 = vpack.c.bf16 %v786_v53, %v786_v53 }
 0x582   : > { %1147 = vmatmul.msk.bf16.vlgmr.msra.gmra.mxu1 %vm469_vm0, %v787_v54 }
 0x5ff   : > { %v816_v52 = vpop.f32.mrf.mxu1 }
 0x600   : > { %v820_v56 = vadd.f32 %v816_v52, %v1808_v4 }
 0x602   : > { %v821_v57 = vmax.f32 %v820_v56, 0.0 }
 0x604   : > { %v822_v58 = vpack.c.bf16 %v821_v57, %v821_v57  ;;  %v826_v59 = vsel %vm469_vm0, %v821_v57, 0.0  ;;  %v837_v60 = vmul.f32 %v821_v57, %v821_v57 }
 0x605   : > { %v827_v61 = vrot.slane %v826_v59, 4 }
 0x606   : > { %v838_v62 = vsel %vm469_vm0, %v837_v60, 0.0  ;;  %824 = vst.msk [vmem:[%s427_s26] sm:$0xf] %vm823_vm9, %v822_v58 }
 0x607   : > { %v828_v63 = vadd.f32 %v827_v61, %v826_v59  ;;  %v839_v0 = vrot.slane %v838_v62, 4  ;;  %v818_v4 = vpop.f32.mrf.mxu1 }
 0x608   : > { %1468 = shalt.err (!%p1465_p11)
}
 0x609   : > { %1172 = dma.vmem_to_hbm [thread:$0]  (%p1731_p4), %s870_s11, 64, %s872_s12, %s848_s13   ;;  %v829_v1 = vrot.slane %v828_v63, 2  ;;  %v840_v2 = vadd.f32 %v839_v0, %v838_v62  ;;  %v825_v8 = vld [vmem:[%s1877_s14] sm:$0x1] }
 0x60a   : > { %s2025_s24 = sld [smem:[#allocation30_spill]]  ;;  %s882_s26 = sshll.u32 %s1877_s14, 4  ;;  %v836_v11 = vld [vmem:[%s1882_s29] sm:$0x1]  ;;  %s883_s26 = int_to_ptr.vmem [resolvable:$true] %s882_s26 }
 0x60b   : > { %v830_v3 = vadd.f32 %v829_v1, %v828_v63  ;;  %v841_v5 = vrot.slane %v840_v2, 2  ;;  %s2027_s10 = sld [smem:[#allocation31_spill]]  ;;  %s895_s11 = sshll.u32 %s1882_s29, 4  ;;  %s1924_s11 = int_to_ptr.vmem [resolvable:$true] %s895_s11 }
 0x60d   : > { %v831_v6 = vrot.slane %v830_v3, 1  ;;  %v842_v7 = vadd.f32 %v841_v5, %v840_v2 }
 0x60f   : > { %v832_v9 = vadd.f32 %v831_v6, %v830_v3  ;;  %v843_v10 = vrot.slane %v842_v7, 1 }
 0x610   : > { %s2026_s20 = smov %s2025_s24  ;;  %s880_s15 = scalar_lea.hbm %s2025_s24, %s1583_s27 }
 0x611   : > { %s893_s4 = scalar_lea.hbm %s2027_s10, %s1583_s27  ;;  %s1915_s22 = sshll.u32 %s880_s15, 4  ;;  %v844_v12 = vadd.f32 %v843_v10, %v842_v7  ;;  %v833_v13 = vadd.f32 %v832_v9, %v825_v8  ;;  %s885_s22 = int_to_ptr.hbm [resolvable:$true] %s1915_s22 }
 0x612   : > { %s1919_s12 = sshll.u32 %s893_s4, 4  ;;  %s853_s27 = scalar_lea.sflag [#allocation14], %s366_s6  ;;  %s898_s12 = int_to_ptr.hbm [resolvable:$true] %s1919_s12 }
 0x613   : > { %835 = vst.msk [vmem:[%s1877_s14] sm:$0x1] %vm489_vm8, %v833_v13  ;;  %v845_v14 = vadd.f32 %v844_v12, %v836_v11  ;;  %s1483_s13 = sshra.s32 %s885_s22, 4  ;;  %s1489_s17 = scalar_lea.hbm %s2026_s20, 2  ;;  %s1484_s13 = int_to_ptr.hbm [resolvable:$true] %s1483_s13 }
 0x614   : > { %s1485_s21 = scalar_lea.hbm %s1484_s13, 1  ;;  %p1490_p2 = scmp.lt.s32.totalorder %s1484_s13, %s2026_s20 }
 0x615   : > { %p1486_p12 = scmp.ne.s32.totalorder %s1484_s13, %s1485_s21  ;;  %p1491_p7 = scmp.lt.s32.totalorder %s1489_s17, %s1485_s21 }
 0x617   : > { %p1487_p13 = pnand %p1486_p12, %p1731_p4  ;;  %p1492_p1 = por %p1491_p7, %p1490_p2 }
 0x619   : > { %p1488_p0 = pneg %p1487_p13 }
 0x61b   : > { %p1493_p3 = pnand %p1492_p1, %p1488_p0 }
 0x61d   : > { %1496 = shalt.err (!%p1493_p3)
}
 0x61e   : > { %1173 = dma.vmem_to_hbm [thread:$0]  (%p1731_p4), %s883_s26, 16, %s885_s22, %s853_s27   ;;  %846 = vst.msk [vmem:[%s1882_s29] sm:$0x1] %vm489_vm8, %v845_v14 }
 0x61f   : > { %s1511_s30 = sshra.s32 %s898_s12, 4  ;;  %s1517_s9 = scalar_lea.hbm %s2027_s10, 2  ;;  %s1512_s30 = int_to_ptr.hbm [resolvable:$true] %s1511_s30 }
 0x620   : > { %s1513_s6 = scalar_lea.hbm %s1512_s30, 1  ;;  %p1518_p10 = scmp.lt.s32.totalorder %s1512_s30, %s2027_s10 }
 0x621   : > { %p1514_p5 = scmp.ne.s32.totalorder %s1512_s30, %s1513_s6  ;;  %p1519_p11 = scmp.lt.s32.totalorder %s1517_s9, %s1513_s6 }
 0x623   : > { %p1515_p6 = pnand %p1514_p5, %p1731_p4  ;;  %p1520_p12 = por %p1519_p11, %p1518_p10 }
 0x625   : > { %p1516_p8 = pneg %p1515_p6 }
 0x627   : > { %p1521_p13 = pnand %p1520_p12, %p1516_p8 }
 0x629   : > { %1524 = shalt.err (!%p1521_p13)
}
 0x62a   : > { %1174 = dma.vmem_to_hbm [thread:$0]  (%p1731_p4), %s1924_s11, 16, %s898_s12, %s853_s27  }
 0x62b PF: > { %s2028_s29 = sld [smem:[#allocation21_spill]] }
 0x62c   : > { %s2030_s7 = sld [smem:[#allocation23_spill]] }
 0x631   : > { %s909_s4 = sand.u32 1, %s2028_s29  }
 0x632   : > { %p2031_p0 = scmp.ge.s32.totalorder %s2030_s7, 2  ;;  %s910_s26 = scalar_lea.sflag [#allocation5], %s909_s4 }
 0x634   : > { %p1196_p2 = pnand %p2031_p0, %p1739_p9 }
 0x636   : > { %p1197_p7 = pneg %p1196_p2 }
 0x638   : > { %1562 = dma.done.wait (%p1197_p7), %s910_s26, 64  }
 0x639   : > { %1564 = vsyncadd (%p1197_p7), %s910_s26, 4294967232  ;;  %s2032_s22 = sadd.s32 4294967294, %s2030_s7  }
 0x63a   : > { %s919_s13 = sand.u32 1, %s2032_s22  }
 0x63b   : > { %s920_s23 = scalar_lea.sflag [#allocation14], %s919_s13 }
 0x63c   : > { %1566 = dma.done.wait (%p1197_p7), %s920_s23, 32  }
 0x63d   : > { %1568 = vsyncadd (%p1197_p7), %s920_s23, 4294967264  ;;  %s31_s29 = sadd.s32 1, %s2030_s7   ;;  %s2033_s11 = sld [smem:[#allocation22_spill]] }
 0x63e   : > { %p28_p4 = scmp.ge.s32.totalorder %s31_s29, 4   ;;  %s2034_s26 = sld [smem:[#allocation25_spill]] }
 0x63f   : > { %s2035_s12 = sld [smem:[#allocation24_spill]]  ;;  %s2036_s24 = smov %s1575_s25 }
 0x640   : > { %s2038_s27 = smov %s1587_s28 }
 0x641   :  { %30 = sbr.rel (!%p28_p4) target bundleno = 17 (0x11), region = 153 }
 0x643   : > { %s2037_s25 = smov %s2033_s11 }
 0x645   : > { %s2039_s28 = smov %s2035_s12 }
 0x646   :  { %934 = vsyncpa [#allocation4], 1 }
 0x647   :  { %936 = vsyncpa [#allocation4 + $0x1], 1 }
 0x648   :  { %937 = vsyncpa [#allocation7], 1 }
 0x649   :  { %939 = vsyncpa [#allocation7 + $0x1], 1 }
 0x64a   :  { %940 = vsyncpa [#allocation10], 1 }
 0x64b   :  { %941 = vsyncpa [#allocation5], 1 }
 0x64c   :  { %943 = vsyncpa [#allocation5 + $0x1], 1 }
 0x64d   :  { %944 = vsyncpa [#allocation14], 1 }
 0x64e   :  { %946 = vsyncpa [#allocation14 + $0x1], 1 }

</bundles_post_ra>
